<compile_context>
chip_gen: v7x
topology: tpu7x:2x2x1
jax: 0.10.0
libtpu: 0.0.40
codegen_flags: <defaults>
</compile_context>

<pallas_src>
import functools
import math

import jax
import jax.numpy as jnp
import numpy as np
from jax.experimental import pallas as pl
from jax.experimental.pallas import tpu as pltpu


def _mha_kernel(xin_ref, xout_ref, mask_ref,
                wq_ref, wk_ref, wv_ref, wl_ref, gamma_ref, beta_ref,
                o_ref, *, n_head, n_factor, fast_att):
    """One grid step = `bb` batch elements.  Head-major weights, fused output
    projection, bf16 MXU operands with f32 accumulation, f32 softmax/LN math."""
    bb, n, d = xin_ref.shape
    f = n_factor
    inv_sqrt_f = 1.0 / math.sqrt(f)

    xin = xin_ref[...].reshape(bb * n, d)                 # f32, kept for the residual
    xin_b = xin.astype(jnp.bfloat16)                      # MXU operand
    xout_b = xout_ref[...].reshape(bb * n, d).astype(jnp.bfloat16)

    # Mask-derived terms hoisted out of the head loop (computed once, reused H times).
    mask = mask_ref[...].astype(jnp.float32)              # (bb, n, n); streamed as bf16
    if not fast_att:
        neg_bias = -10.0 * (1.0 - mask)

    # Fused output projection accumulator: no concat of (n, f) head chunks.
    acc = jnp.zeros((bb * n, d), jnp.float32)

    qk_dims = (((2,), (2,)), ((0,), (0,)))                # bqf,bkf->bqk
    pv_dims = (((2,), (1,)), ((0,), (0,)))                # bqk,bkf->bqf

    for h in range(n_head):                               # small static head count -> unrolled
        # Head-major weight blocks: leading-axis slices only (no lane cuts).
        q = jnp.dot(xin_b, wq_ref[h], preferred_element_type=jnp.float32) * inv_sqrt_f
        k = jnp.dot(xout_b, wk_ref[h], preferred_element_type=jnp.float32)
        v = jnp.dot(xout_b, wv_ref[h], preferred_element_type=jnp.float32)
        q_b = q.reshape(bb, n, f).astype(jnp.bfloat16)
        k_b = k.reshape(bb, n, f).astype(jnp.bfloat16)
        v_b = v.reshape(bb, n, f).astype(jnp.bfloat16)

        s = jax.lax.dot_general(q_b, k_b, qk_dims,
                                preferred_element_type=jnp.float32)   # (bb, n, n) f32
        if fast_att:
            s = s - mask
        else:
            s = mask * s + neg_bias

        m = jnp.max(s, axis=-1, keepdims=True)
        e = jnp.exp(s - m)                                            # unnormalized probs
        inv = pl.reciprocal(jnp.sum(e, axis=-1, keepdims=True), approx=True)  # EUP slot
        if not fast_att:
            e = e * mask                                              # softmax(.) * mask

        # Deferred normalization: matmul unnormalized probs, scale the small (n, f) result.
        u = jax.lax.dot_general(e.astype(jnp.bfloat16), v_b, pv_dims,
                                preferred_element_type=jnp.float32)   # (bb, n, f)
        u = (u * inv).reshape(bb * n, f)

        # Fused output projection: acc += u @ Wl_h  (Wl_h is the (f, d) row-slab of lin.T).
        acc = acc + jnp.dot(u.astype(jnp.bfloat16), wl_ref[h],
                            preferred_element_type=jnp.float32)

    # Residual + LayerNorm (f32; eps matches PyTorch default 1e-5).
    x = xin + acc
    mean = jnp.mean(x, axis=-1, keepdims=True)
    xc = x - mean
    var = jnp.mean(xc * xc, axis=-1, keepdims=True)
    xn = xc * jax.lax.rsqrt(var + 1e-5)
    out = xn * gamma_ref[...] + beta_ref[...]
    o_ref[...] = out.reshape(bb, n, d).astype(o_ref.dtype)


def _pick_batch_block(b, n, d, vmem_budget_bytes=40 << 20):
    """Largest batch block per grid step that fits the VMEM budget, while keeping
    at least 2 parallel grid steps when b > 1 (feeds both v7x TensorCores)."""
    def step_bytes(bb):
        act = 3 * 2 * bb * n * d * 4            # x_inner, x_outer, out: double-buffered f32
        msk = 2 * bb * n * n * 2                # mask: double-buffered bf16
        wts = 2 * (4 * d * d * 2 + 2 * d * 4)   # weights (bf16) + gamma/beta (f32)
        tmp = bb * n * (10 * d + 8 * n) * 4     # acc / q / k / v / score temporaries (f32)
        return act + msk + wts + tmp

    bb = b if b == 1 else -(-b // 2)            # aim for a 2-long parallel grid axis
    while bb > 1 and step_bytes(bb) > vmem_budget_bytes:
        bb -= 1
    return bb


def fast_multi_head_attention(x_inner, x_outer, mask, params, *, n_head, fast_att=True):
    b, n, d = x_inner.shape
    f = d // n_head
    assert n_head * f == d

    # Head-major, pre-transposed, bf16 weights (PyTorch Linear weight is (out, in)):
    #   wq/wk/wv: (H, d, f) so that  x @ wq[h]  is head h's (rows, f) projection,
    #   wl:       (H, f, d) row-slabs of lin.weight.T for the fused output projection.
    wq = params["wq"].T.reshape(d, n_head, f).transpose(1, 0, 2).astype(jnp.bfloat16)
    wk = params["wk"].T.reshape(d, n_head, f).transpose(1, 0, 2).astype(jnp.bfloat16)
    wv = params["wv"].T.reshape(d, n_head, f).transpose(1, 0, 2).astype(jnp.bfloat16)
    wl = params["wl"].T.reshape(n_head, f, d).astype(jnp.bfloat16)
    gamma = params["gamma"].reshape(1, d).astype(jnp.float32)
    beta = params["beta"].reshape(1, d).astype(jnp.float32)
    # 0/1-valued mask is exact in bf16; halves the largest per-step streamed input.
    mask_bf16 = mask.astype(jnp.bfloat16)

    bb = _pick_batch_block(b, n, d)
    grid = (pl.cdiv(b, bb),)

    kernel = functools.partial(_mha_kernel, n_head=n_head, n_factor=f, fast_att=fast_att)

    act_spec = pl.BlockSpec((bb, n, d), lambda i: (i, 0, 0))
    mask_spec = pl.BlockSpec((bb, n, n), lambda i: (i, 0, 0))
    # Constant-index weight blocks: Pallas only re-DMAs when the block index changes,
    # so these are fetched once.  At production d, additionally single-buffer them
    # (pipeline_mode=pl.Buffered(1)) to drop the second VMEM copy on v7x's 64 MiB.
    wqkv_spec = pl.BlockSpec((n_head, d, f), lambda i: (0, 0, 0))
    wl_spec = pl.BlockSpec((n_head, f, d), lambda i: (0, 0, 0))
    vec_spec = pl.BlockSpec((1, d), lambda i: (0, 0))

    return pl.pallas_call(
        kernel,
        out_shape=jax.ShapeDtypeStruct((b, n, d), x_inner.dtype),
        grid=grid,
        in_specs=[act_spec, act_spec, mask_spec,
                  wqkv_spec, wqkv_spec, wqkv_spec, wl_spec, vec_spec, vec_spec],
        out_specs=pl.BlockSpec((bb, n, d), lambda i: (i, 0, 0)),
        compiler_params=pltpu.CompilerParams(
            dimension_semantics=("parallel",),
            vmem_limit_bytes=48 * 1024 * 1024),
    )(x_inner, x_outer, mask_bf16, wq, wk, wv, wl, gamma, beta)


def reference(x_inner, x_outer, mask, params, *, n_head, fast_att=True):
    """Pure-JAX (f32) mirror of the PyTorch forward for correctness checking."""
    b, n, d = x_inner.shape
    f = d // n_head
    Q = (x_inner @ params["wq"].T) / np.sqrt(f)
    K = x_outer @ params["wk"].T
    V = x_outer @ params["wv"].T
    Q = Q.reshape(b, n, n_head, f).transpose(0, 2, 1, 3)   # (b,h,n,f)
    K = K.reshape(b, n, n_head, f).transpose(0, 2, 1, 3)
    V = V.reshape(b, n, n_head, f).transpose(0, 2, 1, 3)
    att = jnp.einsum('bhnf,bhmf->bhnm', Q, K)
    mb = mask[:, None, :, :]
    if fast_att:
        att = jax.nn.softmax(att - mb, axis=-1)
    else:
        att = mb * att - 10.0 * (1.0 - mb)
        att = jax.nn.softmax(att, axis=-1) * mb
    out = jnp.einsum('bhnm,bhmf->bhnf', att, V)
    out = out.transpose(0, 2, 1, 3).reshape(b, n, d)
    out = out @ params["wl"].T
    x = x_inner + out
    mean = jnp.mean(x, axis=-1, keepdims=True)
    var = jnp.mean(jnp.square(x - mean), axis=-1, keepdims=True)
    xn = (x - mean) * jax.lax.rsqrt(var + 1e-5)
    return xn * params["gamma"] + params["beta"]


def glorot_uniform(key, shape):
    fan_out, fan_in = shape
    bound = math.sqrt(6.0 / (fan_in + fan_out))
    return jax.random.uniform(key, shape, jnp.float32, -bound, bound)


if __name__ == "__main__":
    B, N, D, H = 2, 8, 32, 4           # batch, seq, embedding_dim, n_head

    root = jax.random.PRNGKey(0)
    k_xi, k_xo, k_m, k_wq, k_wk, k_wv, k_wl = jax.random.split(root, 7)

    x_inner = jax.random.normal(k_xi, (B, N, D), jnp.float32)
    x_outer = jax.random.normal(k_xo, (B, N, D), jnp.float32)
    # mask: 0/1 matrix (additive penalty in fast_att mode, multiplicative otherwise);
    # `dist` is unused by the n_head > 1 path of the PyTorch forward.
    mask = (jax.random.uniform(k_m, (B, N, N)) > 0.3).astype(jnp.float32)

    params = {
        "wq": glorot_uniform(k_wq, (D, D)),   # PyTorch Linear weight layout (out, in)
        "wk": glorot_uniform(k_wk, (D, D)),
        "wv": glorot_uniform(k_wv, (D, D)),
        "wl": glorot_uniform(k_wl, (D, D)),
        "gamma": jnp.ones((D,), jnp.float32),  # LayerNorm default init
        "beta": jnp.zeros((D,), jnp.float32),
    }

    for fast_att in (True, False):
        out = fast_multi_head_attention(x_inner, x_outer, mask, params,
                                        n_head=H, fast_att=fast_att)
        out = jax.block_until_ready(out)
        ref = reference(x_inner, x_outer, mask, params, n_head=H, fast_att=fast_att)
        # bf16 MXU operands -> looser tolerance than the original f32 kernel.
        np.testing.assert_allclose(np.asarray(out), np.asarray(ref),
                                   rtol=5e-2, atol=5e-2)

    print("KERNEL_OK")
</pallas_src>

<mosaic_0001>
module attributes {stable_mosaic.version = 11 : i64} {
  func.func @_mha_kernel(%arg0: i32, %arg1: memref<1x8x32xf32, #tpu.memory_space<vmem>>, %arg2: memref<1x8x32xf32, #tpu.memory_space<vmem>>, %arg3: memref<1x8x8xbf16, #tpu.memory_space<vmem>>, %arg4: memref<4x32x8xbf16, #tpu.memory_space<vmem>>, %arg5: memref<4x32x8xbf16, #tpu.memory_space<vmem>>, %arg6: memref<4x32x8xbf16, #tpu.memory_space<vmem>>, %arg7: memref<4x8x32xbf16, #tpu.memory_space<vmem>>, %arg8: memref<1x32xf32, #tpu.memory_space<vmem>>, %arg9: memref<1x32xf32, #tpu.memory_space<vmem>>, %arg10: memref<1x8x32xf32, #tpu.memory_space<vmem>>) attributes {dimension_semantics = [#tpu.dimension_semantics<parallel>], iteration_bounds = array<i64: 2>, scalar_prefetch = 0 : i64, scratch_operands = 0 : i64, tpu.core_type = #tpu.core_type<tc>, window_params = [{transform_indices = @transform_0, window_bounds = array<i64: 1, 8, 32>}, {transform_indices = @transform_1, window_bounds = array<i64: 1, 8, 32>}, {transform_indices = @transform_2, window_bounds = array<i64: 1, 8, 8>}, {pipeline_mode = #tpu.pipeline_mode<synchronous>, transform_indices = @transform_3, window_bounds = array<i64: 4, 32, 8>}, {pipeline_mode = #tpu.pipeline_mode<synchronous>, transform_indices = @transform_4, window_bounds = array<i64: 4, 32, 8>}, {pipeline_mode = #tpu.pipeline_mode<synchronous>, transform_indices = @transform_5, window_bounds = array<i64: 4, 32, 8>}, {pipeline_mode = #tpu.pipeline_mode<synchronous>, transform_indices = @transform_6, window_bounds = array<i64: 4, 8, 32>}, {pipeline_mode = #tpu.pipeline_mode<synchronous>, transform_indices = @transform_7, window_bounds = array<i64: 1, 32>}, {pipeline_mode = #tpu.pipeline_mode<synchronous>, transform_indices = @transform_8, window_bounds = array<i64: 1, 32>}, {transform_indices = @transform_9, window_bounds = array<i64: 1, 8, 32>}]} {
    %c0 = arith.constant 0 : index
    %c0_0 = arith.constant 0 : index
    %c0_1 = arith.constant 0 : index
    %0 = vector.load %arg1[%c0, %c0_0, %c0_1] : memref<1x8x32xf32, #tpu.memory_space<vmem>>, vector<1x8x32xf32>
    %1 = vector.shape_cast %0 : vector<1x8x32xf32> to vector<8x32xf32>
    %2 = arith.truncf %1 : vector<8x32xf32> to vector<8x32xbf16>
    %c0_2 = arith.constant 0 : index
    %c0_3 = arith.constant 0 : index
    %c0_4 = arith.constant 0 : index
    %3 = vector.load %arg2[%c0_2, %c0_3, %c0_4] : memref<1x8x32xf32, #tpu.memory_space<vmem>>, vector<1x8x32xf32>
    %4 = vector.shape_cast %3 : vector<1x8x32xf32> to vector<8x32xf32>
    %5 = arith.truncf %4 : vector<8x32xf32> to vector<8x32xbf16>
    %c0_5 = arith.constant 0 : index
    %c0_6 = arith.constant 0 : index
    %c0_7 = arith.constant 0 : index
    %6 = vector.load %arg3[%c0_5, %c0_6, %c0_7] : memref<1x8x8xbf16, #tpu.memory_space<vmem>>, vector<1x8x8xbf16>
    %7 = arith.extf %6 : vector<1x8x8xbf16> to vector<1x8x8xf32>
    %cst = arith.constant 0.000000e+00 : f32
    %8 = vector.broadcast %cst : f32 to vector<8x32xf32>
    %c0_8 = arith.constant 0 : index
    %c0_9 = arith.constant 0 : index
    %c0_10 = arith.constant 0 : index
    %9 = vector.load %arg4[%c0_8, %c0_9, %c0_10] : memref<4x32x8xbf16, #tpu.memory_space<vmem>>, vector<1x32x8xbf16>
    %10 = vector.shape_cast %9 : vector<1x32x8xbf16> to vector<32x8xbf16>
    %cst_11 = arith.constant dense<0.000000e+00> : vector<8x8xf32>
    %11 = tpu.matmul %2, %10, %cst_11 {dimension_numbers = #tpu.dot_dimension_numbers<[1], [0], [0], [1], [0, 0, 1, 1], [], []>} : vector<8x32xbf16>, vector<32x8xbf16>, vector<8x8xf32> -> vector<8x8xf32>
    %cst_12 = arith.constant 0.353553385 : f32
    %12 = vector.broadcast %cst_12 : f32 to vector<8x8xf32>
    %13 = arith.mulf %11, %12 : vector<8x8xf32>
    %c0_13 = arith.constant 0 : index
    %c0_14 = arith.constant 0 : index
    %c0_15 = arith.constant 0 : index
    %14 = vector.load %arg5[%c0_13, %c0_14, %c0_15] : memref<4x32x8xbf16, #tpu.memory_space<vmem>>, vector<1x32x8xbf16>
    %15 = vector.shape_cast %14 : vector<1x32x8xbf16> to vector<32x8xbf16>
    %cst_16 = arith.constant dense<0.000000e+00> : vector<8x8xf32>
    %16 = tpu.matmul %5, %15, %cst_16 {dimension_numbers = #tpu.dot_dimension_numbers<[1], [0], [0], [1], [0, 0, 1, 1], [], []>} : vector<8x32xbf16>, vector<32x8xbf16>, vector<8x8xf32> -> vector<8x8xf32>
    %c0_17 = arith.constant 0 : index
    %c0_18 = arith.constant 0 : index
    %c0_19 = arith.constant 0 : index
    %17 = vector.load %arg6[%c0_17, %c0_18, %c0_19] : memref<4x32x8xbf16, #tpu.memory_space<vmem>>, vector<1x32x8xbf16>
    %18 = vector.shape_cast %17 : vector<1x32x8xbf16> to vector<32x8xbf16>
    %cst_20 = arith.constant dense<0.000000e+00> : vector<8x8xf32>
    %19 = tpu.matmul %5, %18, %cst_20 {dimension_numbers = #tpu.dot_dimension_numbers<[1], [0], [0], [1], [0, 0, 1, 1], [], []>} : vector<8x32xbf16>, vector<32x8xbf16>, vector<8x8xf32> -> vector<8x8xf32>
    %20 = vector.shape_cast %13 : vector<8x8xf32> to vector<1x8x8xf32>
    %21 = arith.truncf %20 : vector<1x8x8xf32> to vector<1x8x8xbf16>
    %22 = vector.shape_cast %16 : vector<8x8xf32> to vector<1x8x8xf32>
    %23 = arith.truncf %22 : vector<1x8x8xf32> to vector<1x8x8xbf16>
    %24 = vector.shape_cast %19 : vector<8x8xf32> to vector<1x8x8xf32>
    %25 = arith.truncf %24 : vector<1x8x8xf32> to vector<1x8x8xbf16>
    %cst_21 = arith.constant dense<0.000000e+00> : vector<1x8x8xf32>
    %26 = tpu.matmul %21, %23, %cst_21 {dimension_numbers = #tpu.dot_dimension_numbers<[2], [2], [1], [1], [0, 0, 0, 1, 1, 1], [0], [0]>} : vector<1x8x8xbf16>, vector<1x8x8xbf16>, vector<1x8x8xf32> -> vector<1x8x8xf32>
    %27 = arith.subf %26, %7 : vector<1x8x8xf32>
    %cst_22 = arith.constant dense<0xFF800000> : vector<1x8xf32>
    %28 = vector.multi_reduction <maximumf>, %27, %cst_22 [2] : vector<1x8x8xf32> to vector<1x8xf32>
    %29 = vector.shape_cast %28 : vector<1x8xf32> to vector<1x8x1xf32>
    %30 = vector.broadcast %29 : vector<1x8x1xf32> to vector<1x8x8xf32>
    %31 = arith.subf %27, %30 : vector<1x8x8xf32>
    %32 = math.exp %31 : vector<1x8x8xf32>
    %cst_23 = arith.constant dense<0.000000e+00> : vector<1x8xf32>
    %33 = vector.multi_reduction <add>, %32, %cst_23 [2] : vector<1x8x8xf32> to vector<1x8xf32>
    %34 = vector.shape_cast %33 : vector<1x8xf32> to vector<1x8x1xf32>
    %35 = tpu.reciprocal %34 {approx = true} : vector<1x8x1xf32> -> vector<1x8x1xf32>
    %36 = arith.truncf %32 : vector<1x8x8xf32> to vector<1x8x8xbf16>
    %cst_24 = arith.constant dense<0.000000e+00> : vector<1x8x8xf32>
    %37 = tpu.matmul %36, %25, %cst_24 {dimension_numbers = #tpu.dot_dimension_numbers<[2], [1], [1], [2], [0, 0, 0, 1, 1, 2], [0], [0]>} : vector<1x8x8xbf16>, vector<1x8x8xbf16>, vector<1x8x8xf32> -> vector<1x8x8xf32>
    %38 = vector.broadcast %35 : vector<1x8x1xf32> to vector<1x8x8xf32>
    %39 = arith.mulf %37, %38 : vector<1x8x8xf32>
    %40 = vector.shape_cast %39 : vector<1x8x8xf32> to vector<8x8xf32>
    %41 = arith.truncf %40 : vector<8x8xf32> to vector<8x8xbf16>
    %c0_25 = arith.constant 0 : index
    %c0_26 = arith.constant 0 : index
    %c0_27 = arith.constant 0 : index
    %42 = vector.load %arg7[%c0_25, %c0_26, %c0_27] : memref<4x8x32xbf16, #tpu.memory_space<vmem>>, vector<1x8x32xbf16>
    %43 = vector.shape_cast %42 : vector<1x8x32xbf16> to vector<8x32xbf16>
    %cst_28 = arith.constant dense<0.000000e+00> : vector<8x32xf32>
    %44 = tpu.matmul %41, %43, %cst_28 {dimension_numbers = #tpu.dot_dimension_numbers<[1], [0], [0], [1], [0, 0, 1, 1], [], []>} : vector<8x8xbf16>, vector<8x32xbf16>, vector<8x32xf32> -> vector<8x32xf32>
    %45 = arith.addf %8, %44 : vector<8x32xf32>
    %c1 = arith.constant 1 : index
    %c0_29 = arith.constant 0 : index
    %c0_30 = arith.constant 0 : index
    %46 = vector.load %arg4[%c1, %c0_29, %c0_30] : memref<4x32x8xbf16, #tpu.memory_space<vmem>>, vector<1x32x8xbf16>
    %47 = vector.shape_cast %46 : vector<1x32x8xbf16> to vector<32x8xbf16>
    %cst_31 = arith.constant dense<0.000000e+00> : vector<8x8xf32>
    %48 = tpu.matmul %2, %47, %cst_31 {dimension_numbers = #tpu.dot_dimension_numbers<[1], [0], [0], [1], [0, 0, 1, 1], [], []>} : vector<8x32xbf16>, vector<32x8xbf16>, vector<8x8xf32> -> vector<8x8xf32>
    %cst_32 = arith.constant 0.353553385 : f32
    %49 = vector.broadcast %cst_32 : f32 to vector<8x8xf32>
    %50 = arith.mulf %48, %49 : vector<8x8xf32>
    %c1_33 = arith.constant 1 : index
    %c0_34 = arith.constant 0 : index
    %c0_35 = arith.constant 0 : index
    %51 = vector.load %arg5[%c1_33, %c0_34, %c0_35] : memref<4x32x8xbf16, #tpu.memory_space<vmem>>, vector<1x32x8xbf16>
    %52 = vector.shape_cast %51 : vector<1x32x8xbf16> to vector<32x8xbf16>
    %cst_36 = arith.constant dense<0.000000e+00> : vector<8x8xf32>
    %53 = tpu.matmul %5, %52, %cst_36 {dimension_numbers = #tpu.dot_dimension_numbers<[1], [0], [0], [1], [0, 0, 1, 1], [], []>} : vector<8x32xbf16>, vector<32x8xbf16>, vector<8x8xf32> -> vector<8x8xf32>
    %c1_37 = arith.constant 1 : index
    %c0_38 = arith.constant 0 : index
    %c0_39 = arith.constant 0 : index
    %54 = vector.load %arg6[%c1_37, %c0_38, %c0_39] : memref<4x32x8xbf16, #tpu.memory_space<vmem>>, vector<1x32x8xbf16>
    %55 = vector.shape_cast %54 : vector<1x32x8xbf16> to vector<32x8xbf16>
    %cst_40 = arith.constant dense<0.000000e+00> : vector<8x8xf32>
    %56 = tpu.matmul %5, %55, %cst_40 {dimension_numbers = #tpu.dot_dimension_numbers<[1], [0], [0], [1], [0, 0, 1, 1], [], []>} : vector<8x32xbf16>, vector<32x8xbf16>, vector<8x8xf32> -> vector<8x8xf32>
    %57 = vector.shape_cast %50 : vector<8x8xf32> to vector<1x8x8xf32>
    %58 = arith.truncf %57 : vector<1x8x8xf32> to vector<1x8x8xbf16>
    %59 = vector.shape_cast %53 : vector<8x8xf32> to vector<1x8x8xf32>
    %60 = arith.truncf %59 : vector<1x8x8xf32> to vector<1x8x8xbf16>
    %61 = vector.shape_cast %56 : vector<8x8xf32> to vector<1x8x8xf32>
    %62 = arith.truncf %61 : vector<1x8x8xf32> to vector<1x8x8xbf16>
    %cst_41 = arith.constant dense<0.000000e+00> : vector<1x8x8xf32>
    %63 = tpu.matmul %58, %60, %cst_41 {dimension_numbers = #tpu.dot_dimension_numbers<[2], [2], [1], [1], [0, 0, 0, 1, 1, 1], [0], [0]>} : vector<1x8x8xbf16>, vector<1x8x8xbf16>, vector<1x8x8xf32> -> vector<1x8x8xf32>
    %64 = arith.subf %63, %7 : vector<1x8x8xf32>
    %cst_42 = arith.constant dense<0xFF800000> : vector<1x8xf32>
    %65 = vector.multi_reduction <maximumf>, %64, %cst_42 [2] : vector<1x8x8xf32> to vector<1x8xf32>
    %66 = vector.shape_cast %65 : vector<1x8xf32> to vector<1x8x1xf32>
    %67 = vector.broadcast %66 : vector<1x8x1xf32> to vector<1x8x8xf32>
    %68 = arith.subf %64, %67 : vector<1x8x8xf32>
    %69 = math.exp %68 : vector<1x8x8xf32>
    %cst_43 = arith.constant dense<0.000000e+00> : vector<1x8xf32>
    %70 = vector.multi_reduction <add>, %69, %cst_43 [2] : vector<1x8x8xf32> to vector<1x8xf32>
    %71 = vector.shape_cast %70 : vector<1x8xf32> to vector<1x8x1xf32>
    %72 = tpu.reciprocal %71 {approx = true} : vector<1x8x1xf32> -> vector<1x8x1xf32>
    %73 = arith.truncf %69 : vector<1x8x8xf32> to vector<1x8x8xbf16>
    %cst_44 = arith.constant dense<0.000000e+00> : vector<1x8x8xf32>
    %74 = tpu.matmul %73, %62, %cst_44 {dimension_numbers = #tpu.dot_dimension_numbers<[2], [1], [1], [2], [0, 0, 0, 1, 1, 2], [0], [0]>} : vector<1x8x8xbf16>, vector<1x8x8xbf16>, vector<1x8x8xf32> -> vector<1x8x8xf32>
    %75 = vector.broadcast %72 : vector<1x8x1xf32> to vector<1x8x8xf32>
    %76 = arith.mulf %74, %75 : vector<1x8x8xf32>
    %77 = vector.shape_cast %76 : vector<1x8x8xf32> to vector<8x8xf32>
    %78 = arith.truncf %77 : vector<8x8xf32> to vector<8x8xbf16>
    %c1_45 = arith.constant 1 : index
    %c0_46 = arith.constant 0 : index
    %c0_47 = arith.constant 0 : index
    %79 = vector.load %arg7[%c1_45, %c0_46, %c0_47] : memref<4x8x32xbf16, #tpu.memory_space<vmem>>, vector<1x8x32xbf16>
    %80 = vector.shape_cast %79 : vector<1x8x32xbf16> to vector<8x32xbf16>
    %cst_48 = arith.constant dense<0.000000e+00> : vector<8x32xf32>
    %81 = tpu.matmul %78, %80, %cst_48 {dimension_numbers = #tpu.dot_dimension_numbers<[1], [0], [0], [1], [0, 0, 1, 1], [], []>} : vector<8x8xbf16>, vector<8x32xbf16>, vector<8x32xf32> -> vector<8x32xf32>
    %82 = arith.addf %45, %81 : vector<8x32xf32>
    %c2 = arith.constant 2 : index
    %c0_49 = arith.constant 0 : index
    %c0_50 = arith.constant 0 : index
    %83 = vector.load %arg4[%c2, %c0_49, %c0_50] : memref<4x32x8xbf16, #tpu.memory_space<vmem>>, vector<1x32x8xbf16>
    %84 = vector.shape_cast %83 : vector<1x32x8xbf16> to vector<32x8xbf16>
    %cst_51 = arith.constant dense<0.000000e+00> : vector<8x8xf32>
    %85 = tpu.matmul %2, %84, %cst_51 {dimension_numbers = #tpu.dot_dimension_numbers<[1], [0], [0], [1], [0, 0, 1, 1], [], []>} : vector<8x32xbf16>, vector<32x8xbf16>, vector<8x8xf32> -> vector<8x8xf32>
    %cst_52 = arith.constant 0.353553385 : f32
    %86 = vector.broadcast %cst_52 : f32 to vector<8x8xf32>
    %87 = arith.mulf %85, %86 : vector<8x8xf32>
    %c2_53 = arith.constant 2 : index
    %c0_54 = arith.constant 0 : index
    %c0_55 = arith.constant 0 : index
    %88 = vector.load %arg5[%c2_53, %c0_54, %c0_55] : memref<4x32x8xbf16, #tpu.memory_space<vmem>>, vector<1x32x8xbf16>
    %89 = vector.shape_cast %88 : vector<1x32x8xbf16> to vector<32x8xbf16>
    %cst_56 = arith.constant dense<0.000000e+00> : vector<8x8xf32>
    %90 = tpu.matmul %5, %89, %cst_56 {dimension_numbers = #tpu.dot_dimension_numbers<[1], [0], [0], [1], [0, 0, 1, 1], [], []>} : vector<8x32xbf16>, vector<32x8xbf16>, vector<8x8xf32> -> vector<8x8xf32>
    %c2_57 = arith.constant 2 : index
    %c0_58 = arith.constant 0 : index
    %c0_59 = arith.constant 0 : index
    %91 = vector.load %arg6[%c2_57, %c0_58, %c0_59] : memref<4x32x8xbf16, #tpu.memory_space<vmem>>, vector<1x32x8xbf16>
    %92 = vector.shape_cast %91 : vector<1x32x8xbf16> to vector<32x8xbf16>
    %cst_60 = arith.constant dense<0.000000e+00> : vector<8x8xf32>
    %93 = tpu.matmul %5, %92, %cst_60 {dimension_numbers = #tpu.dot_dimension_numbers<[1], [0], [0], [1], [0, 0, 1, 1], [], []>} : vector<8x32xbf16>, vector<32x8xbf16>, vector<8x8xf32> -> vector<8x8xf32>
    %94 = vector.shape_cast %87 : vector<8x8xf32> to vector<1x8x8xf32>
    %95 = arith.truncf %94 : vector<1x8x8xf32> to vector<1x8x8xbf16>
    %96 = vector.shape_cast %90 : vector<8x8xf32> to vector<1x8x8xf32>
    %97 = arith.truncf %96 : vector<1x8x8xf32> to vector<1x8x8xbf16>
    %98 = vector.shape_cast %93 : vector<8x8xf32> to vector<1x8x8xf32>
    %99 = arith.truncf %98 : vector<1x8x8xf32> to vector<1x8x8xbf16>
    %cst_61 = arith.constant dense<0.000000e+00> : vector<1x8x8xf32>
    %100 = tpu.matmul %95, %97, %cst_61 {dimension_numbers = #tpu.dot_dimension_numbers<[2], [2], [1], [1], [0, 0, 0, 1, 1, 1], [0], [0]>} : vector<1x8x8xbf16>, vector<1x8x8xbf16>, vector<1x8x8xf32> -> vector<1x8x8xf32>
    %101 = arith.subf %100, %7 : vector<1x8x8xf32>
    %cst_62 = arith.constant dense<0xFF800000> : vector<1x8xf32>
    %102 = vector.multi_reduction <maximumf>, %101, %cst_62 [2] : vector<1x8x8xf32> to vector<1x8xf32>
    %103 = vector.shape_cast %102 : vector<1x8xf32> to vector<1x8x1xf32>
    %104 = vector.broadcast %103 : vector<1x8x1xf32> to vector<1x8x8xf32>
    %105 = arith.subf %101, %104 : vector<1x8x8xf32>
    %106 = math.exp %105 : vector<1x8x8xf32>
    %cst_63 = arith.constant dense<0.000000e+00> : vector<1x8xf32>
    %107 = vector.multi_reduction <add>, %106, %cst_63 [2] : vector<1x8x8xf32> to vector<1x8xf32>
    %108 = vector.shape_cast %107 : vector<1x8xf32> to vector<1x8x1xf32>
    %109 = tpu.reciprocal %108 {approx = true} : vector<1x8x1xf32> -> vector<1x8x1xf32>
    %110 = arith.truncf %106 : vector<1x8x8xf32> to vector<1x8x8xbf16>
    %cst_64 = arith.constant dense<0.000000e+00> : vector<1x8x8xf32>
    %111 = tpu.matmul %110, %99, %cst_64 {dimension_numbers = #tpu.dot_dimension_numbers<[2], [1], [1], [2], [0, 0, 0, 1, 1, 2], [0], [0]>} : vector<1x8x8xbf16>, vector<1x8x8xbf16>, vector<1x8x8xf32> -> vector<1x8x8xf32>
    %112 = vector.broadcast %109 : vector<1x8x1xf32> to vector<1x8x8xf32>
    %113 = arith.mulf %111, %112 : vector<1x8x8xf32>
    %114 = vector.shape_cast %113 : vector<1x8x8xf32> to vector<8x8xf32>
    %115 = arith.truncf %114 : vector<8x8xf32> to vector<8x8xbf16>
    %c2_65 = arith.constant 2 : index
    %c0_66 = arith.constant 0 : index
    %c0_67 = arith.constant 0 : index
    %116 = vector.load %arg7[%c2_65, %c0_66, %c0_67] : memref<4x8x32xbf16, #tpu.memory_space<vmem>>, vector<1x8x32xbf16>
    %117 = vector.shape_cast %116 : vector<1x8x32xbf16> to vector<8x32xbf16>
    %cst_68 = arith.constant dense<0.000000e+00> : vector<8x32xf32>
    %118 = tpu.matmul %115, %117, %cst_68 {dimension_numbers = #tpu.dot_dimension_numbers<[1], [0], [0], [1], [0, 0, 1, 1], [], []>} : vector<8x8xbf16>, vector<8x32xbf16>, vector<8x32xf32> -> vector<8x32xf32>
    %119 = arith.addf %82, %118 : vector<8x32xf32>
    %c3 = arith.constant 3 : index
    %c0_69 = arith.constant 0 : index
    %c0_70 = arith.constant 0 : index
    %120 = vector.load %arg4[%c3, %c0_69, %c0_70] : memref<4x32x8xbf16, #tpu.memory_space<vmem>>, vector<1x32x8xbf16>
    %121 = vector.shape_cast %120 : vector<1x32x8xbf16> to vector<32x8xbf16>
    %cst_71 = arith.constant dense<0.000000e+00> : vector<8x8xf32>
    %122 = tpu.matmul %2, %121, %cst_71 {dimension_numbers = #tpu.dot_dimension_numbers<[1], [0], [0], [1], [0, 0, 1, 1], [], []>} : vector<8x32xbf16>, vector<32x8xbf16>, vector<8x8xf32> -> vector<8x8xf32>
    %cst_72 = arith.constant 0.353553385 : f32
    %123 = vector.broadcast %cst_72 : f32 to vector<8x8xf32>
    %124 = arith.mulf %122, %123 : vector<8x8xf32>
    %c3_73 = arith.constant 3 : index
    %c0_74 = arith.constant 0 : index
    %c0_75 = arith.constant 0 : index
    %125 = vector.load %arg5[%c3_73, %c0_74, %c0_75] : memref<4x32x8xbf16, #tpu.memory_space<vmem>>, vector<1x32x8xbf16>
    %126 = vector.shape_cast %125 : vector<1x32x8xbf16> to vector<32x8xbf16>
    %cst_76 = arith.constant dense<0.000000e+00> : vector<8x8xf32>
    %127 = tpu.matmul %5, %126, %cst_76 {dimension_numbers = #tpu.dot_dimension_numbers<[1], [0], [0], [1], [0, 0, 1, 1], [], []>} : vector<8x32xbf16>, vector<32x8xbf16>, vector<8x8xf32> -> vector<8x8xf32>
    %c3_77 = arith.constant 3 : index
    %c0_78 = arith.constant 0 : index
    %c0_79 = arith.constant 0 : index
    %128 = vector.load %arg6[%c3_77, %c0_78, %c0_79] : memref<4x32x8xbf16, #tpu.memory_space<vmem>>, vector<1x32x8xbf16>
    %129 = vector.shape_cast %128 : vector<1x32x8xbf16> to vector<32x8xbf16>
    %cst_80 = arith.constant dense<0.000000e+00> : vector<8x8xf32>
    %130 = tpu.matmul %5, %129, %cst_80 {dimension_numbers = #tpu.dot_dimension_numbers<[1], [0], [0], [1], [0, 0, 1, 1], [], []>} : vector<8x32xbf16>, vector<32x8xbf16>, vector<8x8xf32> -> vector<8x8xf32>
    %131 = vector.shape_cast %124 : vector<8x8xf32> to vector<1x8x8xf32>
    %132 = arith.truncf %131 : vector<1x8x8xf32> to vector<1x8x8xbf16>
    %133 = vector.shape_cast %127 : vector<8x8xf32> to vector<1x8x8xf32>
    %134 = arith.truncf %133 : vector<1x8x8xf32> to vector<1x8x8xbf16>
    %135 = vector.shape_cast %130 : vector<8x8xf32> to vector<1x8x8xf32>
    %136 = arith.truncf %135 : vector<1x8x8xf32> to vector<1x8x8xbf16>
    %cst_81 = arith.constant dense<0.000000e+00> : vector<1x8x8xf32>
    %137 = tpu.matmul %132, %134, %cst_81 {dimension_numbers = #tpu.dot_dimension_numbers<[2], [2], [1], [1], [0, 0, 0, 1, 1, 1], [0], [0]>} : vector<1x8x8xbf16>, vector<1x8x8xbf16>, vector<1x8x8xf32> -> vector<1x8x8xf32>
    %138 = arith.subf %137, %7 : vector<1x8x8xf32>
    %cst_82 = arith.constant dense<0xFF800000> : vector<1x8xf32>
    %139 = vector.multi_reduction <maximumf>, %138, %cst_82 [2] : vector<1x8x8xf32> to vector<1x8xf32>
    %140 = vector.shape_cast %139 : vector<1x8xf32> to vector<1x8x1xf32>
    %141 = vector.broadcast %140 : vector<1x8x1xf32> to vector<1x8x8xf32>
    %142 = arith.subf %138, %141 : vector<1x8x8xf32>
    %143 = math.exp %142 : vector<1x8x8xf32>
    %cst_83 = arith.constant dense<0.000000e+00> : vector<1x8xf32>
    %144 = vector.multi_reduction <add>, %143, %cst_83 [2] : vector<1x8x8xf32> to vector<1x8xf32>
    %145 = vector.shape_cast %144 : vector<1x8xf32> to vector<1x8x1xf32>
    %146 = tpu.reciprocal %145 {approx = true} : vector<1x8x1xf32> -> vector<1x8x1xf32>
    %147 = arith.truncf %143 : vector<1x8x8xf32> to vector<1x8x8xbf16>
    %cst_84 = arith.constant dense<0.000000e+00> : vector<1x8x8xf32>
    %148 = tpu.matmul %147, %136, %cst_84 {dimension_numbers = #tpu.dot_dimension_numbers<[2], [1], [1], [2], [0, 0, 0, 1, 1, 2], [0], [0]>} : vector<1x8x8xbf16>, vector<1x8x8xbf16>, vector<1x8x8xf32> -> vector<1x8x8xf32>
    %149 = vector.broadcast %146 : vector<1x8x1xf32> to vector<1x8x8xf32>
    %150 = arith.mulf %148, %149 : vector<1x8x8xf32>
    %151 = vector.shape_cast %150 : vector<1x8x8xf32> to vector<8x8xf32>
    %152 = arith.truncf %151 : vector<8x8xf32> to vector<8x8xbf16>
    %c3_85 = arith.constant 3 : index
    %c0_86 = arith.constant 0 : index
    %c0_87 = arith.constant 0 : index
    %153 = vector.load %arg7[%c3_85, %c0_86, %c0_87] : memref<4x8x32xbf16, #tpu.memory_space<vmem>>, vector<1x8x32xbf16>
    %154 = vector.shape_cast %153 : vector<1x8x32xbf16> to vector<8x32xbf16>
    %cst_88 = arith.constant dense<0.000000e+00> : vector<8x32xf32>
    %155 = tpu.matmul %152, %154, %cst_88 {dimension_numbers = #tpu.dot_dimension_numbers<[1], [0], [0], [1], [0, 0, 1, 1], [], []>} : vector<8x8xbf16>, vector<8x32xbf16>, vector<8x32xf32> -> vector<8x32xf32>
    %156 = arith.addf %119, %155 : vector<8x32xf32>
    %157 = arith.addf %1, %156 : vector<8x32xf32>
    %cst_89 = arith.constant dense<0.000000e+00> : vector<8xf32>
    %158 = vector.multi_reduction <add>, %157, %cst_89 [1] : vector<8x32xf32> to vector<8xf32>
    %159 = vector.shape_cast %158 : vector<8xf32> to vector<8x1xf32>
    %cst_90 = arith.constant 3.200000e+01 : f32
    %160 = vector.broadcast %cst_90 : f32 to vector<8x1xf32>
    %161 = arith.divf %159, %160 : vector<8x1xf32>
    %162 = vector.broadcast %161 : vector<8x1xf32> to vector<8x32xf32>
    %163 = arith.subf %157, %162 : vector<8x32xf32>
    %164 = arith.mulf %163, %163 : vector<8x32xf32>
    %cst_91 = arith.constant dense<0.000000e+00> : vector<8xf32>
    %165 = vector.multi_reduction <add>, %164, %cst_91 [1] : vector<8x32xf32> to vector<8xf32>
    %166 = vector.shape_cast %165 : vector<8xf32> to vector<8x1xf32>
    %cst_92 = arith.constant 3.200000e+01 : f32
    %167 = vector.broadcast %cst_92 : f32 to vector<8x1xf32>
    %168 = arith.divf %166, %167 : vector<8x1xf32>
    %cst_93 = arith.constant 9.99999974E-6 : f32
    %169 = vector.broadcast %cst_93 : f32 to vector<8x1xf32>
    %170 = arith.addf %168, %169 : vector<8x1xf32>
    %171 = math.rsqrt %170 : vector<8x1xf32>
    %172 = vector.broadcast %171 : vector<8x1xf32> to vector<8x32xf32>
    %173 = arith.mulf %163, %172 : vector<8x32xf32>
    %c0_94 = arith.constant 0 : index
    %c0_95 = arith.constant 0 : index
    %174 = vector.load %arg8[%c0_94, %c0_95] : memref<1x32xf32, #tpu.memory_space<vmem>>, vector<1x32xf32>
    %175 = vector.broadcast %174 : vector<1x32xf32> to vector<8x32xf32>
    %176 = arith.mulf %173, %175 : vector<8x32xf32>
    %c0_96 = arith.constant 0 : index
    %c0_97 = arith.constant 0 : index
    %177 = vector.load %arg9[%c0_96, %c0_97] : memref<1x32xf32, #tpu.memory_space<vmem>>, vector<1x32xf32>
    %178 = vector.broadcast %177 : vector<1x32xf32> to vector<8x32xf32>
    %179 = arith.addf %176, %178 : vector<8x32xf32>
    %180 = vector.shape_cast %179 : vector<8x32xf32> to vector<1x8x32xf32>
    %c0_98 = arith.constant 0 : index
    %c0_99 = arith.constant 0 : index
    %c0_100 = arith.constant 0 : index
    %181 = vector.load %arg10[%c0_98, %c0_99, %c0_100] : memref<1x8x32xf32, #tpu.memory_space<vmem>>, vector<1x8x32xf32>
    tpu.vector_store %arg10[%c0_98, %c0_99, %c0_100], %180 {strides = array<i32>} : memref<1x8x32xf32, #tpu.memory_space<vmem>>, vector<1x8x32xf32>,
    return
  }
  func.func @transform_0(%arg0: i32) -> (i32, i32, i32) {
    %c0_i32 = arith.constant 0 : i32
    %c0_i32_0 = arith.constant 0 : i32
    %c0_i32_1 = arith.constant 0 : i32
    return %arg0, %c0_i32, %c0_i32_0 : i32, i32, i32
  }
  func.func @transform_1(%arg0: i32) -> (i32, i32, i32) {
    %c0_i32 = arith.constant 0 : i32
    %c0_i32_0 = arith.constant 0 : i32
    %c0_i32_1 = arith.constant 0 : i32
    return %arg0, %c0_i32, %c0_i32_0 : i32, i32, i32
  }
  func.func @transform_2(%arg0: i32) -> (i32, i32, i32) {
    %c0_i32 = arith.constant 0 : i32
    %c0_i32_0 = arith.constant 0 : i32
    %c0_i32_1 = arith.constant 0 : i32
    return %arg0, %c0_i32, %c0_i32_0 : i32, i32, i32
  }
  func.func @transform_3(%arg0: i32) -> (i32, i32, i32) {
    %c0_i32 = arith.constant 0 : i32
    %c0_i32_0 = arith.constant 0 : i32
    %c0_i32_1 = arith.constant 0 : i32
    %c0_i32_2 = arith.constant 0 : i32
    return %c0_i32, %c0_i32_0, %c0_i32_1 : i32, i32, i32
  }
  func.func @transform_4(%arg0: i32) -> (i32, i32, i32) {
    %c0_i32 = arith.constant 0 : i32
    %c0_i32_0 = arith.constant 0 : i32
    %c0_i32_1 = arith.constant 0 : i32
    %c0_i32_2 = arith.constant 0 : i32
    return %c0_i32, %c0_i32_0, %c0_i32_1 : i32, i32, i32
  }
  func.func @transform_5(%arg0: i32) -> (i32, i32, i32) {
    %c0_i32 = arith.constant 0 : i32
    %c0_i32_0 = arith.constant 0 : i32
    %c0_i32_1 = arith.constant 0 : i32
    %c0_i32_2 = arith.constant 0 : i32
    return %c0_i32, %c0_i32_0, %c0_i32_1 : i32, i32, i32
  }
  func.func @transform_6(%arg0: i32) -> (i32, i32, i32) {
    %c0_i32 = arith.constant 0 : i32
    %c0_i32_0 = arith.constant 0 : i32
    %c0_i32_1 = arith.constant 0 : i32
    %c0_i32_2 = arith.constant 0 : i32
    return %c0_i32, %c0_i32_0, %c0_i32_1 : i32, i32, i32
  }
  func.func @transform_7(%arg0: i32) -> (i32, i32) {
    %c0_i32 = arith.constant 0 : i32
    %c0_i32_0 = arith.constant 0 : i32
    %c0_i32_1 = arith.constant 0 : i32
    return %c0_i32, %c0_i32_0 : i32, i32
  }
  func.func @transform_8(%arg0: i32) -> (i32, i32) {
    %c0_i32 = arith.constant 0 : i32
    %c0_i32_0 = arith.constant 0 : i32
    %c0_i32_1 = arith.constant 0 : i32
    return %c0_i32, %c0_i32_0 : i32, i32
  }
  func.func @transform_9(%arg0: i32) -> (i32, i32, i32) {
    %c0_i32 = arith.constant 0 : i32
    %c0_i32_0 = arith.constant 0 : i32
    %c0_i32_1 = arith.constant 0 : i32
    return %arg0, %c0_i32, %c0_i32_0 : i32, i32, i32
  }
}

</mosaic_0001>

<bundles_post_ra>
// kernel: tpu_custom_call.1
= control target key start
LH: loop header
LB: loop body
LE: loop exit
PB: predicated region body
PF: predicated region fallthrough
CT: control target
= control target key end

     0   :  { %14 = vsyncpa [#allocation3], 0  ;;  %s2711_s0 = inlined_call_operand.vmem [shape: f32[2,8,32], index: 0, kind: input, shape index: {}]   ;;  %s2712_s1 = inlined_call_operand.vmem [shape: f32[2,8,32], index: 1, kind: input, shape index: {}]   ;;  %s2713_s2 = inlined_call_operand.vmem [shape: bf16[2,8,8], index: 2, kind: input, shape index: {}]   ;;  %s2714_s3 = inlined_call_operand.vmem [shape: bf16[4,32,8], index: 3, kind: input, shape index: {}]   ;;  %s2715_s4 = inlined_call_operand.vmem [shape: bf16[4,32,8], index: 4, kind: input, shape index: {}]   ;;  %s2716_s5 = inlined_call_operand.vmem [shape: bf16[4,32,8], index: 5, kind: input, shape index: {}]   ;;  %s2717_s6 = inlined_call_operand.vmem [shape: bf16[4,8,32], index: 6, kind: input, shape index: {}]   ;;  %s2718_s7 = inlined_call_operand.vmem [shape: f32[1,32], index: 7, kind: input, shape index: {}]   ;;  %s2719_s8 = inlined_call_operand.vmem [shape: f32[1,32], index: 8, kind: input, shape index: {}]   ;;  %s2720_s9 = inlined_call_operand.hbm [shape: f32[2,8,32], index: 9, kind: output, shape index: {}]  }
   0x1   :  { %16 = vsyncpa [#allocation3 + $0x1], 0  ;;  %s2350_s30 = smov 0   ;;  %s2352_s10 = smov 0  }
   0x2   :  { %s2354_s11 = smov 0   ;;  %s2356_s12 = smov 0  }
   0x3 LB: > { %s2371_s13 = sadd.s32 4294967295, %s2295_s12   ;;  %s1821_s14 = sadd.s32 4294967294, %s2295_s12   ;;  %s2295_s12 = sphi %s2356_s12, %s2726_s12   ;;  %s2291_s11 = sphi %s2354_s11, %s2725_s11   ;;  %s2287_s10 = sphi %s2352_s10, %s2724_s10   ;;  %s2283_s30 = sphi %s2350_s30, %s2723_s30  }
   0x4   : > { %s2375_s15 = sadd.s32 1, %s2295_s12   ;;  %s233_s16 = sadd.s32 1, %s2291_s11 }
   0x5   : > { %s230_s17 = ssub.s32 %s2295_s12, %s2375_s15  ;;  %p243_p0 = scmp.ne.s32.totalorder %s2291_s11, %s2287_s10 }
   0x6   : > { %p231_p1 = scmp.eq.s32.totalorder %s230_s17, 0  ;;  %p244_p2 = scmp.eq.s32.totalorder %s2371_s13, 1 }
   0x7   : > { %p249_p3 = scmp.ne.s32.totalorder %s2287_s10, %s2283_s30  ;;  %p250_p4 = scmp.eq.s32.totalorder %s1821_s14, 1 }
   0x8   : > { %s2386_s18 = scalar_select %p231_p1, %s2291_s11, %s233_s16  }
   0x9   : > { %p2388_p5 = por %p244_p2, %p243_p0  ;;  %p2392_p6 = por %p250_p4, %p249_p3 }
   0xa   : > { %p1824_p7 = scmp.ge.s32.totalorder %s2295_s12, 1  ;;  %p307_p8 = scmp.lt.s32.totalorder %s2295_s12, 3 }
   0xc   : > { %p308_p9 = pnand %p1824_p7, %p307_p8 }
   0xd   : > { %v2191_v0 = vld [vmem:[%s2715_s4] sm:$0xff] (!%p308_p9)   ;;  %v2297_v1 = vmov (!%p308_p9), 0.0   ;;  %v2193_v3 = vld [vmem:[%s2715_s4 + $0x8] sm:$0xff] (!%p308_p9)   ;;  %vm2298_vm0 = vmmov (!%p308_p9), 0   ;;  %p350_p10 = scmp.lt.s32.totalorder (!%p308_p9), %s2371_s13, 1  ;;  %vm385_vm1 = vcmask (!%p308_p9), 261120  }
   0xe   : > { %311 = sbr.rel (%p308_p9) target bundleno = 3621 (0xe25), region = 56  ;;  %1990 = vmatprep.subr.bf16.mxu1 (!%p308_p9), %v2297_v1  ;;  %1982 = vmatprep.subr.bf16.mxu0 (!%p308_p9), %v2297_v1  ;;  %v2192_v2 = vld [vmem:[%s2714_s3] sm:$0xff] (!%p308_p9)   ;;  %v2194_v4 = vld [vmem:[%s2714_s3 + $0x8] sm:$0xff] (!%p308_p9)   ;;  %vm548_vm2 = vcmask (!%p308_p9), 64512   ;;  %vm610_vm3 = vcmask (!%p308_p9), 1043456   ;;  %v2198_v37 = vld [vmem:[%s2714_s3 + $0x10] sm:$0xff] (!%p308_p9)  }
   0xf   : > { %1991 = vmatpush3.bf16.msra.mxu1 (!%p308_p9), %v2191_v0  ;;  %1994 = vmatprep.mubr.msk.bf16.mxu1 (!%p308_p9), %vm2298_vm0, %v2297_v1  ;;  %v2195_v9 = vld [vmem:[%s2716_s5] sm:$0xff] (!%p308_p9)   ;;  %v2196_v10 = vld [vmem:[%s2716_s5 + $0x8] sm:$0xff] (!%p308_p9)   ;;  %v2200_v38 = vld [vmem:[%s2714_s3 + $0x18] sm:$0xff] (!%p308_p9)   ;;  %s1919_s23 = sshll.u32 (!%p308_p9), %s2371_s13, 7 }
  0x10   : > { %1983 = vmatpush3.bf16.msra.mxu0 (!%p308_p9), %v2192_v2  ;;  %1992 = vmatprep.subr.bf16.mxu1 (!%p308_p9), %v2297_v1  ;;  %v2197_v43 = vld [vmem:[%s2715_s4 + $0x10] sm:$0xff] (!%p308_p9)   ;;  %v2199_v46 = vld [vmem:[%s2715_s4 + $0x18] sm:$0xff] (!%p308_p9)   ;;  %s2668_s28 = scalar_lea.hbm (!%p308_p9), %s2720_s9, %s1919_s23 }
  0x11   : > { %1984 = vmatprep.subr.bf16.mxu0 (!%p308_p9), %v2297_v1  ;;  %1986 = vmatprep.mubr.msk.bf16.mxu0 (!%p308_p9), %vm2298_vm0, %v2297_v1  ;;  %v2201_v51 = vld [vmem:[%s2716_s5 + $0x10] sm:$0xff] (!%p308_p9)   ;;  %v2202_v52 = vld [vmem:[%s2716_s5 + $0x18] sm:$0xff] (!%p308_p9)  }
  0x13   : > { %1993 = vmatpush3.bf16.msra.mxu1 (!%p308_p9), %v2193_v3 }
  0x14   : > { %1985 = vmatpush3.bf16.msra.mxu0 (!%p308_p9), %v2194_v4  ;;  %2006 = vmatprep.subr.bf16.mxu1 (!%p308_p9), %v2297_v1 }
  0x15   : > { %s2418_s29 = scalar_select %p350_p10, %s2371_s13, 1  ;;  %1998 = vmatprep.subr.bf16.mxu0 %v2297_v1 }
  0x16   : > { %s2299_s13 = smov [#allocation2]  }
  0x17   : > { %s1826_s14 = sshll.u32 %s2418_s29, 3 }
  0x18   : > { %s357_s21 = scalar_lea.vmem %s2712_s1, %s1826_s14  ;;  %s353_s24 = scalar_lea.vmem %s2711_s0, %s1826_s14 }
  0x19   : > { %v365_v5 = vld [vmem:[%s357_s21] sm:$0xff]  ;;  %s1828_s14 = sshll.u32 %s2418_s29, 2 }
  0x1a   : > { %v2430_v6 = vld [vmem:[%s353_s24] sm:$0xff]  ;;  %v2433_v7 = vpack.c.bf16 %v365_v5, %v365_v5  ;;  %s361_s21 = scalar_lea.vmem %s2713_s2, %s1828_s14  ;;  %s347_s14 = sand.u32 1, %s2287_s10  }
  0x1b   : > { %v2437_v8 = vpack.c.bf16 %v2430_v6, %v2430_v6  ;;  %v367_v23 = vld [vmem:[%s361_s21] sm:$0xf]  ;;  %s1825_s16 = sshll.u32 %s347_s14, 3  ;;  %s1725_s17 = scalar_lea.sflag [#allocation3], %s347_s14 }
  0x1c   : > { %1995 = vmatmul.mubr.msk.bf16.vlgmr.msra.gmra.mrb[0].mxu1 %vm385_vm1, %v2433_v7  ;;  %v2468_v24 = vunpack.c.l.bf16 %v367_v23  ;;  %s349_s24 = scalar_lea.vmem [#allocation2], %s1825_s16  ;;  %s2237_s16 = sshll.u32 %s2299_s13, 4  ;;  %s2238_s16 = int_to_ptr.vmem [resolvable:$false] %s2237_s16 }
  0x1d   : > { %1987 = vmatmul.mubr.msk.bf16.vlgmr.msra.gmra.mrb[0].mxu0 %vm385_vm1, %v2437_v8  ;;  %2008 = vmatprep.mubr.msk.bf16.mxu1 %vm2298_vm0, %v2297_v1  ;;  %s1738_s25 = sshll.u32 %s349_s24, 4  ;;  %s2239_s29 = scalar_lea.vmem %s2238_s16, 256  ;;  %s2670_s25 = int_to_ptr.vmem [resolvable:$true] %s1738_s25 }
  0x1e   : > { %2002 = vmatprep.mubr.msk.bf16.mxu0 %vm2298_vm0, %v2297_v1  ;;  %1999 = vmatpush3.bf16.msra.mxu0 %v2195_v9  ;;  %s2233_s21 = scalar_lea.vmem %s2670_s25, 128  ;;  %p2240_p0 = scmp.lt.s32.totalorder %s2670_s25, %s2238_s16 }
  0x1f   : > { %2000 = vmatprep.subr.bf16.mxu0 %v2297_v1  ;;  %p2234_p11 = scmp.ne.s32.totalorder %s2670_s25, %s2233_s21  ;;  %p2241_p1 = scmp.lt.s32.totalorder %s2239_s29, %s2233_s21 }
  0x21   : > { %p2235_p12 = pnand %p2234_p11, %p2388_p5  ;;  %p2242_p2 = por %p2241_p1, %p2240_p0 }
  0x22   : > { %2001 = vmatpush3.bf16.msra.mxu0 %v2196_v10 }
  0x23   : > { %2012 = vmatprep.subr.bf16.mxu0 %v2297_v1  ;;  %p2236_p13 = pneg %p2235_p12 }
  0x25   : > { %2003 = vmatmul.mubr.msk.bf16.vlgmr.msra.gmra.mrb[4].mxu0 %vm385_vm1, %v2433_v7  ;;  %p2243_p3 = pnand %p2242_p2, %p2236_p13 }
  0x26   : > { %2014 = vmatprep.mubr.msk.bf16.mxu0 %vm2298_vm0, %v2297_v1 }
  0xef   : > { %v483_v11 = vpop.f32.mrb[0].mxu1 }
  0xf0   : > { %v423_v12 = vpop.f32.mrb[0].mxu0  ;;  %v546_v13 = vpack.c.bf16 %v483_v11, %v483_v11  ;;  %v1996_v14 = vpop.f32.mrb[1].mxu1 }
  0xf1   : > { %v1988_v15 = vpop.f32.mrb[1].mxu0  ;;  %v486_v16 = vpop.f32.mrb[2].mxu1  ;;  %v429_v19 = vmul.f32 0.35355338, %v423_v12 }
  0xf2   : > { %v426_v17 = vpop.f32.mrb[2].mxu0  ;;  %v553_v18 = vsel %vm548_vm2, %v546_v13, 0  ;;  %v1997_v20 = vpop.f32.mrb[3].mxu1 }
  0xf3   : > { %v1989_v21 = vpop.f32.mrb[3].mxu0  ;;  %2007 = vmatpush3.bf16.xpose.msra.mxu1 %v553_v18  ;;  %v545_v22 = vpack.c.bf16 %v429_v19, %v429_v19 }
  0xf4   : > { %2018 = vmatprep.subr.bf16.mxu1 %v2297_v1  ;;  %v656_v21 = vld [vmem:[%s2717_s6] sm:$0xf] }
  0xf8   : > { %v539_v31 = vpop.f32.mrb[4].mxu0 }
  0xf9   : > { %v547_v32 = vpack.c.bf16 %v539_v31, %v539_v31  ;;  %v2004_v33 = vpop.f32.mrb[5].mxu0  ;;  %v1863_v31 = vld [vmem:[%s2717_s6 + $0x4] sm:$0xf] }
  0xfa   : > { %2009 = vmatmul.mubr.msk.bf16.vlgmr.msra.gmra.mrb[4].mxu1 %vm548_vm2, %v545_v22  ;;  %v542_v34 = vpop.f32.mrb[6].mxu0  ;;  %v2204_v33 = vld [vmem:[%s2715_s4 + $0x28] sm:$0xff]  }
  0xfb   : > { %2022 = vmatprep.mubr.msk.bf16.mxu1 %vm2298_vm0, %v2297_v1  ;;  %v612_v35 = vsel %vm610_vm3, %v547_v32, 0  ;;  %v2005_v36 = vpop.f32.mrb[7].mxu0  ;;  %2019 = vmatpush3.bf16.msra.mxu1 %v2198_v37  ;;  %v944_v32 = vsel %vm610_vm3, %v1863_v31, 0 }
  0xfc   : > { %2013 = vmatpush3.bf16.msra.mxu0 %v612_v35  ;;  %2020 = vmatprep.subr.bf16.mxu1 %v2297_v1 }
  0xfd   : > { %2026 = vmatprep.subr.bf16.mxu0 %v2297_v1 }
  0xff   : > { %2021 = vmatpush3.bf16.msra.mxu1 %v2200_v38 }
 0x100   : > { %2034 = vmatprep.subr.bf16.mxu1 %v2297_v1 }
 0x102   : > { %2023 = vmatmul.mubr.msk.bf16.vlgmr.msra.gmra.mrb[8].mxu1 %vm385_vm1, %v2437_v8 }
 0x103   : > { %2038 = vmatprep.mubr.msk.bf16.mxu1 %vm2298_vm0, %v2297_v1  ;;  %2035 = vmatpush3.bf16.msra.mxu1 %v2201_v51 }
 0x104   : > { %2036 = vmatprep.subr.bf16.mxu1 %v2297_v1 }
 0x107   : > { %2037 = vmatpush3.bf16.msra.mxu1 %v2202_v52 }
 0x108   : > { %2048 = vmatprep.subr.bf16.mxu1 %v2297_v1 }
 0x10a   : > { %2039 = vmatmul.mubr.msk.bf16.vlgmr.msra.gmra.mrb[12].mxu1 %vm385_vm1, %v2433_v7 }
 0x10b   : > { %2050 = vmatprep.mubr.msk.bf16.mxu1 %vm2298_vm0, %v2297_v1 }
 0x1cd   : > { %v589_v25 = vpop.f32.mrb[4].mxu1 }
 0x1ce   : > { %v595_v26 = vsub.f32 %v589_v25, %v2468_v24  ;;  %v2010_v27 = vpop.f32.mrb[5].mxu1 }
 0x1cf   : > { %v592_v28 = vpop.f32.mrb[6].mxu1 }
 0x1d0   : > { %v2011_v29 = vpop.f32.mrb[7].mxu1  ;;  %v596_v30 = vsel %vm548_vm2, %v595_v26, -inf }
 0x1d1   : > { %597 = vmax.xlane.f32.xlu0 %v596_v30  ;;  %v2203_v30 = vld [vmem:[%s2715_s4 + $0x20] sm:$0xff]  }
 0x1d5   : > { %v708_v47 = vpop.f32.mrb[8].mxu1 }
 0x1d6   : > { %v2024_v48 = vpop.f32.mrb[9].mxu1  ;;  %v714_v62 = vmul.f32 0.35355338, %v708_v47 }
 0x1d7   : > { %v711_v49 = vpop.f32.mrb[10].mxu1 }
 0x1d8   : > { %v2025_v50 = vpop.f32.mrb[11].mxu1  ;;  %v829_v0 = vpack.c.bf16 %v714_v62, %v714_v62 }
 0x1dd   : > { %v823_v11 = vpop.f32.mrb[12].mxu1 }
 0x1de   : > { %v831_v12 = vpack.c.bf16 %v823_v11, %v823_v11  ;;  %v2040_v13 = vpop.f32.mrb[13].mxu1 }
 0x1df   : > { %v826_v14 = vpop.f32.mrb[14].mxu1 }
 0x1e0   : > { %v894_v15 = vsel %vm610_vm3, %v831_v12, 0  ;;  %v2041_v16 = vpop.f32.mrb[15].mxu1 }
 0x1e1   : > { %2049 = vmatpush3.bf16.msra.mxu1 %v894_v15 }
 0x1e2   : > { %2060 = vmatprep.subr.bf16.mxu1 %v2297_v1 }
 0x25e   : > { %v598_v39 = vpop.xlane.xlu0 %597 }
 0x25f   : > { %v599_v40 = vsub.f32 %v595_v26, %v598_v39  ;;  %v990_v26 = vsel %vm610_vm3, %v656_v21, 0 }
 0x261   : > { %v600_v41 = vmul.f32 1.442695, %v599_v40  ;;  %v2205_v40 = vld [vmem:[%s2714_s3 + $0x20] sm:$0xff]  }
 0x263   : > { %2215 = vpow2.f32 %v600_v41 }
 0x26d   : > { %v2216_v42 = vpop.eup %2215 }
 0x26e   : > { %v602_v44 = vsel %vm548_vm2, %v2216_v42, 0.0  ;;  %v606_v45 = vpack.c.bf16 %v2216_v42, %v2216_v42 }
 0x26f   : > { %603 = vadd.xlane.f32.xlu1 %v602_v44 }
 0x270   : > { %2015 = vmatmul.mubr.msk.bf16.vlgmr.msra.gmra.mrb[8].mxu0 %vm548_vm2, %v606_v45 }
 0x271   : > { %2027 = vmatpush3.bf16.msra.mxu0 %v2197_v43  ;;  %2030 = vmatprep.mubr.msk.bf16.mxu0 %vm2298_vm0, %v2297_v1  ;;  %v2206_v43 = vld [vmem:[%s2714_s3 + $0x28] sm:$0xff]  }
 0x272   : > { %2028 = vmatprep.subr.bf16.mxu0 %v2297_v1 }
 0x275   : > { %2029 = vmatpush3.bf16.msra.mxu0 %v2199_v46 }
 0x276   : > { %2042 = vmatprep.subr.bf16.mxu0 %v2297_v1 }
 0x278   : > { %2031 = vmatmul.mubr.msk.bf16.vlgmr.msra.gmra.mrb[12].mxu0 %vm385_vm1, %v2433_v7 }
 0x279   : > { %2044 = vmatprep.mubr.msk.bf16.mxu0 %vm2298_vm0, %v2297_v1 }
 0x2fc   : > { %v604_v20 = vpop.xlane.xlu1 %603 }
 0x343   : > { %v648_v53 = vpop.f32.mrb[8].mxu0 }
 0x344   : > { %v2016_v54 = vpop.f32.mrb[9].mxu0 }
 0x345   : > { %v651_v55 = vpop.f32.mrb[10].mxu0  ;;  %v2207_v54 = vld [vmem:[%s2716_s5 + $0x20] sm:$0xff]  }
 0x346   : > { %v2017_v56 = vpop.f32.mrb[11].mxu0  ;;  %v2208_v55 = vld [vmem:[%s2716_s5 + $0x28] sm:$0xff]  }
 0x34b   : > { %v766_v57 = vpop.f32.mrb[12].mxu0 }
 0x34c   : > { %v830_v58 = vpack.c.bf16 %v766_v57, %v766_v57  ;;  %v2032_v59 = vpop.f32.mrb[13].mxu0 }
 0x34d   : > { %v769_v60 = vpop.f32.mrb[14].mxu0 }
 0x34e   : > { %v836_v61 = vsel %vm548_vm2, %v830_v58, 0  ;;  %v2033_v63 = vpop.f32.mrb[15].mxu0 }
 0x34f   : > { %2043 = vmatpush3.bf16.xpose.msra.mxu0 %v836_v61 }
 0x350   : > { %2054 = vmatprep.subr.bf16.mxu0 %v2297_v1 }
 0x356   : > { %2045 = vmatmul.mubr.msk.bf16.vlgmr.msra.gmra.mrb[16].mxu0 %vm548_vm2, %v829_v0 }
 0x357   : > { %2056 = vmatprep.mubr.msk.bf16.mxu0 %vm2298_vm0, %v2297_v1  ;;  %2055 = vmatpush3.bf16.msra.mxu0 %v944_v32 }
 0x358   : > { %2066 = vmatprep.subr.bf16.mxu0 %v2297_v1 }
 0x429   : > { %v872_v2 = vpop.f32.mrb[16].mxu0 }
 0x42a   : > { %v878_v3 = vsub.f32 %v872_v2, %v2468_v24  ;;  %v2046_v4 = vpop.f32.mrb[17].mxu0 }
 0x42b   : > { %v875_v5 = vpop.f32.mrb[18].mxu0 }
 0x42c   : > { %v2047_v9 = vpop.f32.mrb[19].mxu0  ;;  %v879_v10 = vsel %vm548_vm2, %v878_v3, -inf }
 0x42d   : > { %880 = vmax.xlane.f32.xlu0 %v879_v10 }
 0x4ba   : > { %v881_v17 = vpop.xlane.xlu0 %880 }
 0x4bb   : > { %v882_v18 = vsub.f32 %v878_v3, %v881_v17 }
 0x4bd   : > { %v883_v19 = vmul.f32 1.442695, %v882_v18 }
 0x4bf   : > { %2217 = vpow2.f32 %v883_v19 }
 0x4c0   : > { %2219 = vrcp.f32 %v604_v20 }
 0x4c9   : > { %v2218_v22 = vpop.eup %2217 }
 0x4ca   : > { %v885_v23 = vsel %vm548_vm2, %v2218_v22, 0.0  ;;  %v889_v25 = vpack.c.bf16 %v2218_v22, %v2218_v22  ;;  %v2220_v27 = vpop.eup %2219 }
 0x4cb   : > { %886 = vadd.xlane.f32.xlu1 %v885_v23  ;;  %v654_v28 = vmul.f32 %v2220_v27, %v648_v53 }
 0x4cc   : > { %2051 = vmatmul.mubr.msk.bf16.vlgmr.msra.gmra.mrb[16].mxu1 %vm548_vm2, %v889_v25 }
 0x4cd   : > { %2061 = vmatpush3.bf16.msra.mxu1 %v990_v26  ;;  %2062 = vmatprep.mubr.msk.bf16.mxu1 %vm2298_vm0, %v2297_v1  ;;  %v655_v29 = vpack.c.bf16 %v654_v28, %v654_v28  ;;  %v1889_v26 = vld [vmem:[%s2717_s6 + $0x8] sm:$0xf]  ;;  %v2210_v28 = vld [vmem:[%s2714_s3 + $0x30] sm:$0xff]  }
 0x4ce   : > { %2074 = vmatprep.subr.bf16.mxu1 %v2297_v1  ;;  %v1319_v27 = vsel %vm610_vm3, %v1889_v26, 0 }
 0x4d4   : > { %2063 = vmatmul.mubr.msk.bf16.vlgmr.msra.gmra.mrb[20].mxu1 %vm548_vm2, %v655_v29  ;;  %v2212_v29 = vld [vmem:[%s2714_s3 + $0x38] sm:$0xff]  }
 0x4d5   : > { %2078 = vmatprep.mubr.msk.bf16.mxu1 %vm2298_vm0, %v2297_v1  ;;  %2075 = vmatpush3.bf16.msra.mxu1 %v2203_v30 }
 0x4d6   : > { %2076 = vmatprep.subr.bf16.mxu1 %v2297_v1 }
 0x4d9   : > { %2077 = vmatpush3.bf16.msra.mxu1 %v2204_v33 }
 0x4da   : > { %2090 = vmatprep.subr.bf16.mxu1 %v2297_v1 }
 0x4dc   : > { %2079 = vmatmul.mubr.msk.bf16.vlgmr.msra.gmra.mrb[24].mxu1 %vm385_vm1, %v2433_v7 }
 0x4dd   : > { %2092 = vmatprep.mubr.msk.bf16.mxu1 %vm2298_vm0, %v2297_v1 }
 0x558   : > { %v887_v34 = vpop.xlane.xlu1 %886 }
 0x559   : > { %2221 = vrcp.f32 %v887_v34 }
 0x563   : > { %v2222_v35 = vpop.eup %2221 }
 0x59f   : > { %v930_v36 = vpop.f32.mrb[16].mxu1 }
 0x5a0   : > { %v936_v37 = vmul.f32 %v2222_v35, %v930_v36  ;;  %v2052_v38 = vpop.f32.mrb[17].mxu1  ;;  %v2209_v36 = vld [vmem:[%s2715_s4 + $0x30] sm:$0xff]  }
 0x5a1   : > { %v933_v39 = vpop.f32.mrb[18].mxu1 }
 0x5a2   : > { %v937_v41 = vpack.c.bf16 %v936_v37, %v936_v37  ;;  %v2053_v42 = vpop.f32.mrb[19].mxu1 }
 0x5a4   : > { %2057 = vmatmul.mubr.msk.bf16.vlgmr.msra.gmra.mrb[20].mxu0 %vm548_vm2, %v937_v41 }
 0x5a5   : > { %2067 = vmatpush3.bf16.msra.mxu0 %v2205_v40  ;;  %2070 = vmatprep.mubr.msk.bf16.mxu0 %vm2298_vm0, %v2297_v1 }
 0x5a6   : > { %2068 = vmatprep.subr.bf16.mxu0 %v2297_v1 }
 0x5a7   : > { %v1026_v44 = vpop.f32.mrb[20].mxu1 }
 0x5a8   : > { %v2064_v45 = vpop.f32.mrb[21].mxu1 }
 0x5a9   : > { %v1029_v46 = vpop.f32.mrb[22].mxu1  ;;  %2069 = vmatpush3.bf16.msra.mxu0 %v2206_v43  ;;  %v2213_v43 = vld [vmem:[%s2716_s5 + $0x30] sm:$0xff]  }
 0x5aa   : > { %v2065_v47 = vpop.f32.mrb[23].mxu1  ;;  %2082 = vmatprep.subr.bf16.mxu0 %v2297_v1 }
 0x5ac   : > { %2071 = vmatmul.mubr.msk.bf16.vlgmr.msra.gmra.mrb[24].mxu0 %vm385_vm1, %v2437_v8 }
 0x5ad   : > { %2086 = vmatprep.mubr.msk.bf16.mxu0 %vm2298_vm0, %v2297_v1  ;;  %2083 = vmatpush3.bf16.msra.mxu0 %v2207_v54 }
 0x5ae   : > { %2084 = vmatprep.subr.bf16.mxu0 %v2297_v1 }
 0x5af   : > { %v1141_v48 = vpop.f32.mrb[24].mxu1 }
 0x5b0   : > { %v1205_v49 = vpack.c.bf16 %v1141_v48, %v1141_v48  ;;  %v2080_v50 = vpop.f32.mrb[25].mxu1 }
 0x5b1   : > { %v1144_v51 = vpop.f32.mrb[26].mxu1  ;;  %2085 = vmatpush3.bf16.msra.mxu0 %v2208_v55 }
 0x5b2   : > { %v1211_v52 = vsel %vm548_vm2, %v1205_v49, 0  ;;  %v2081_v53 = vpop.f32.mrb[27].mxu1  ;;  %2096 = vmatprep.subr.bf16.mxu0 %v2297_v1 }
 0x5b3   : > { %2091 = vmatpush3.bf16.xpose.msra.mxu1 %v1211_v52 }
 0x5b4   : > { %2102 = vmatprep.subr.bf16.mxu1 %v2297_v1  ;;  %2087 = vmatmul.mubr.msk.bf16.vlgmr.msra.gmra.mrb[28].mxu0 %vm385_vm1, %v2433_v7 }
 0x5b5   : > { %2098 = vmatprep.mubr.msk.bf16.mxu0 %vm2298_vm0, %v2297_v1 }
 0x677   : > { %v980_v56 = vpop.f32.mrb[20].mxu0 }
 0x678   : > { %v2581_v57 = vadd.f32 %v1026_v44, %v980_v56  ;;  %v2058_v58 = vpop.f32.mrb[21].mxu0  ;;  %v2214_v44 = vld [vmem:[%s2716_s5 + $0x38] sm:$0xff]  }
 0x679   : > { %v983_v59 = vpop.f32.mrb[22].mxu0 }
 0x67a   : > { %v2059_v60 = vpop.f32.mrb[23].mxu0 }
 0x67f   : > { %v1083_v61 = vpop.f32.mrb[24].mxu0 }
 0x680   : > { %v1089_v62 = vmul.f32 0.35355338, %v1083_v61  ;;  %v2072_v63 = vpop.f32.mrb[25].mxu0 }
 0x681   : > { %v1086_v0 = vpop.f32.mrb[26].mxu0 }
 0x682   : > { %v1204_v2 = vpack.c.bf16 %v1089_v62, %v1089_v62  ;;  %v2073_v3 = vpop.f32.mrb[27].mxu0 }
 0x684   : > { %2093 = vmatmul.mubr.msk.bf16.vlgmr.msra.gmra.mrb[28].mxu1 %vm548_vm2, %v1204_v2 }
 0x685   : > { %2104 = vmatprep.mubr.msk.bf16.mxu1 %vm2298_vm0, %v2297_v1  ;;  %2103 = vmatpush3.bf16.msra.mxu1 %v1319_v27 }
 0x686   : > { %2116 = vmatprep.subr.bf16.mxu1 %v2297_v1 }
 0x687   : > { %v1198_v13 = vpop.f32.mrb[28].mxu0 }
 0x688   : > { %v1206_v14 = vpack.c.bf16 %v1198_v13, %v1198_v13  ;;  %v2088_v15 = vpop.f32.mrb[29].mxu0  ;;  %v1914_v13 = vld [vmem:[%s2717_s6 + $0xc] sm:$0xf] }
 0x689   : > { %v1201_v16 = vpop.f32.mrb[30].mxu0 }
 0x68a   : > { %v1269_v17 = vsel %vm610_vm3, %v1206_v14, 0  ;;  %v2089_v18 = vpop.f32.mrb[31].mxu0  ;;  %v1649_v14 = vsel %vm610_vm3, %v1914_v13, 0 }
 0x68b   : > { %2097 = vmatpush3.bf16.msra.mxu0 %v1269_v17 }
 0x68c   : > { %2108 = vmatprep.subr.bf16.mxu0 %v2297_v1 }
 0x757   : > { %v1247_v4 = vpop.f32.mrb[28].mxu1 }
 0x758   : > { %v1253_v5 = vsub.f32 %v1247_v4, %v2468_v24  ;;  %v2094_v9 = vpop.f32.mrb[29].mxu1 }
 0x759   : > { %v1250_v10 = vpop.f32.mrb[30].mxu1 }
 0x75a   : > { %v2095_v11 = vpop.f32.mrb[31].mxu1  ;;  %v1254_v12 = vsel %vm548_vm2, %v1253_v5, -inf }
 0x75b   : > { %1255 = vmax.xlane.f32.xlu0 %v1254_v12 }
 0x7e8   : > { %v1256_v19 = vpop.xlane.xlu0 %1255 }
 0x7e9   : > { %v1257_v20 = vsub.f32 %v1253_v5, %v1256_v19 }
 0x7eb   : > { %v1258_v21 = vmul.f32 1.442695, %v1257_v20 }
 0x7ed   : > { %2223 = vpow2.f32 %v1258_v21 }
 0x7f7   : > { %v2224_v22 = vpop.eup %2223 }
 0x7f8   : > { %v1260_v23 = vsel %vm548_vm2, %v2224_v22, 0.0  ;;  %v1264_v25 = vpack.c.bf16 %v2224_v22, %v2224_v22 }
 0x7f9   : > { %1261 = vadd.xlane.f32.xlu1 %v1260_v23 }
 0x7fa   : > { %2099 = vmatmul.mubr.msk.bf16.vlgmr.msra.gmra.mrb[32].mxu0 %vm548_vm2, %v1264_v25 }
 0x7fb   : > { %2112 = vmatprep.mubr.msk.bf16.mxu0 %vm2298_vm0, %v2297_v1  ;;  %2109 = vmatpush3.bf16.msra.mxu0 %v2210_v28 }
 0x7fc   : > { %2110 = vmatprep.subr.bf16.mxu0 %v2297_v1 }
 0x7ff   : > { %2111 = vmatpush3.bf16.msra.mxu0 %v2212_v29 }
 0x800   : > { %2124 = vmatprep.subr.bf16.mxu0 %v2297_v1 }
 0x802   : > { %2113 = vmatmul.mubr.msk.bf16.vlgmr.msra.gmra.mrb[36].mxu0 %vm385_vm1, %v2437_v8  ;;  %v2211_v8 = vld [vmem:[%s2715_s4 + $0x38] sm:$0xff]  }
 0x803   : > { %2128 = vmatprep.mubr.msk.bf16.mxu0 %vm2298_vm0, %v2297_v1  ;;  %2125 = vmatpush3.bf16.msra.mxu0 %v2213_v43 }
 0x804   : > { %2126 = vmatprep.subr.bf16.mxu0 %v2297_v1 }
 0x807   : > { %2127 = vmatpush3.bf16.msra.mxu0 %v2214_v44 }
 0x808   : > { %2138 = vmatprep.subr.bf16.mxu0 %v2297_v1 }
 0x80a   : > { %2129 = vmatmul.mubr.msk.bf16.vlgmr.msra.gmra.mrb[40].mxu0 %vm385_vm1, %v2433_v7 }
 0x80b   : > { %2140 = vmatprep.mubr.msk.bf16.mxu0 %vm2298_vm0, %v2297_v1 }
 0x886   : > { %v1262_v30 = vpop.xlane.xlu1 %1261 }
 0x887   : > { %2225 = vrcp.f32 %v1262_v30 }
 0x891   : > { %v2226_v31 = vpop.eup %2225 }
 0x8cd   : > { %v1305_v32 = vpop.f32.mrb[32].mxu0 }
 0x8ce   : > { %v1311_v33 = vmul.f32 %v2226_v31, %v1305_v32  ;;  %v2100_v34 = vpop.f32.mrb[33].mxu0 }
 0x8cf   : > { %v1308_v35 = vpop.f32.mrb[34].mxu0 }
 0x8d0   : > { %v1312_v37 = vpack.c.bf16 %v1311_v33, %v1311_v33  ;;  %v2101_v38 = vpop.f32.mrb[35].mxu0 }
 0x8d2   : > { %2105 = vmatmul.mubr.msk.bf16.vlgmr.msra.gmra.mrb[32].mxu1 %vm548_vm2, %v1312_v37 }
 0x8d3   : > { %2117 = vmatpush3.bf16.msra.mxu1 %v2209_v36  ;;  %2120 = vmatprep.mubr.msk.bf16.mxu1 %vm2298_vm0, %v2297_v1 }
 0x8d4   : > { %2118 = vmatprep.subr.bf16.mxu1 %v2297_v1 }
 0x8d5   : > { %v1413_v39 = vpop.f32.mrb[36].mxu0 }
 0x8d6   : > { %v2114_v40 = vpop.f32.mrb[37].mxu0  ;;  %v1419_v56 = vmul.f32 0.35355338, %v1413_v39 }
 0x8d7   : > { %2119 = vmatpush3.bf16.msra.mxu1 %v2211_v8  ;;  %v1416_v41 = vpop.f32.mrb[38].mxu0  ;;  %v1917_v40 = vld [vmem:[%s2719_s8] ss:$0 sm:$0xff] }
 0x8d8   : > { %2132 = vmatprep.subr.bf16.mxu1 %v2297_v1  ;;  %v2115_v42 = vpop.f32.mrb[39].mxu0 }
 0x8da   : > { %2121 = vmatmul.mubr.msk.bf16.vlgmr.msra.gmra.mrb[36].mxu1 %vm385_vm1, %v2433_v7  ;;  %v1534_v7 = vpack.c.bf16 %v1419_v56, %v1419_v56 }
 0x8db   : > { %2134 = vmatprep.mubr.msk.bf16.mxu1 %vm2298_vm0, %v2297_v1 }
 0x8dd   : > { %v1528_v63 = vpop.f32.mrb[40].mxu0 }
 0x8de   : > { %v1536_v0 = vpack.c.bf16 %v1528_v63, %v1528_v63  ;;  %v2130_v2 = vpop.f32.mrb[41].mxu0 }
 0x8df   : > { %v1531_v3 = vpop.f32.mrb[42].mxu0 }
 0x8e0   : > { %v1599_v4 = vsel %vm610_vm3, %v1536_v0, 0  ;;  %v2131_v5 = vpop.f32.mrb[43].mxu0 }
 0x8e1   : > { %2139 = vmatpush3.bf16.msra.mxu0 %v1599_v4 }
 0x9a5   : > { %v1355_v45 = vpop.f32.mrb[32].mxu1 }
 0x9a6   : > { %v1361_v46 = vadd.f32 %v1355_v45, %v2581_v57  ;;  %v2106_v47 = vpop.f32.mrb[33].mxu1 }
 0x9a7   : > { %v1358_v48 = vpop.f32.mrb[34].mxu1 }
 0x9a8   : > { %v2107_v49 = vpop.f32.mrb[35].mxu1 }
 0x9ad   : > { %v1471_v50 = vpop.f32.mrb[36].mxu1 }
 0x9ae   : > { %v1535_v51 = vpack.c.bf16 %v1471_v50, %v1471_v50  ;;  %v2122_v52 = vpop.f32.mrb[37].mxu1 }
 0x9af   : > { %v1474_v53 = vpop.f32.mrb[38].mxu1 }
 0x9b0   : > { %v1541_v54 = vsel %vm548_vm2, %v1535_v51, 0  ;;  %v2123_v55 = vpop.f32.mrb[39].mxu1 }
 0x9b1   : > { %2133 = vmatpush3.bf16.xpose.msra.mxu1 %v1541_v54 }
 0x9b2   : > { %2144 = vmatprep.subr.bf16.mxu1 %v2297_v1 }
 0x9b8   : > { %2135 = vmatmul.mubr.msk.bf16.vlgmr.msra.gmra.mrb[40].mxu1 %vm548_vm2, %v1534_v7 }
 0x9b9   : > { %2146 = vmatprep.mubr.msk.bf16.mxu1 %vm2298_vm0, %v2297_v1  ;;  %2145 = vmatpush3.bf16.msra.mxu1 %v1649_v14 }
 0xa8b   : > { %v1577_v57 = vpop.f32.mrb[40].mxu1 }
 0xa8c   : > { %v1583_v58 = vsub.f32 %v1577_v57, %v2468_v24  ;;  %v2136_v59 = vpop.f32.mrb[41].mxu1 }
 0xa8d   : > { %v1580_v60 = vpop.f32.mrb[42].mxu1 }
 0xa8e   : > { %v2137_v61 = vpop.f32.mrb[43].mxu1  ;;  %v1584_v62 = vsel %vm548_vm2, %v1583_v58, -inf }
 0xa8f   : > { %1585 = vmax.xlane.f32.xlu0 %v1584_v62 }
 0xb1c   : > { %v1586_v9 = vpop.xlane.xlu0 %1585 }
 0xb1d   : > { %v1587_v10 = vsub.f32 %v1583_v58, %v1586_v9 }
 0xb1f   : > { %v1588_v1 = vmul.f32 1.442695, %v1587_v10 }
 0xb21   : > { %2227 = vpow2.f32 %v1588_v1 }
 0xb2b   : > { %v2228_v11 = vpop.eup %2227 }
 0xb2c   : > { %v1590_v24 = vsel %vm548_vm2, %v2228_v11, 0.0  ;;  %v1594_v12 = vpack.c.bf16 %v2228_v11, %v2228_v11 }
 0xb2d   : > { %1591 = vadd.xlane.f32.xlu1 %v1590_v24 }
 0xb2e   : > { %2141 = vmatmul.mubr.msk.bf16.vlgmr.msra.gmra.mrb[44].mxu0 %vm548_vm2, %v1594_v12 }
 0xbba   : > { %v1592_v15 = vpop.xlane.xlu1 %1591 }
 0xbbb   : > { %2229 = vrcp.f32 %v1592_v15 }
 0xbc5   : > { %v2230_v16 = vpop.eup %2229 }
 0xc01   : > { %v1635_v17 = vpop.f32.mrb[44].mxu0 }
 0xc02   : > { %v1641_v18 = vmul.f32 %v2230_v16, %v1635_v17  ;;  %v2142_v19 = vpop.f32.mrb[45].mxu0 }
 0xc03   : > { %v1638_v20 = vpop.f32.mrb[46].mxu0 }
 0xc04   : > { %v1642_v21 = vpack.c.bf16 %v1641_v18, %v1641_v18  ;;  %v2143_v22 = vpop.f32.mrb[47].mxu0 }
 0xc06   : > { %2147 = vmatmul.mubr.msk.bf16.vlgmr.msra.gmra.mrb[44].mxu1 %vm548_vm2, %v1642_v21 }
 0xcd9   : > { %v1685_v23 = vpop.f32.mrb[44].mxu1 }
 0xcda   : > { %v1691_v25 = vadd.f32 %v1685_v23, %v1361_v46  ;;  %v2148_v26 = vpop.f32.mrb[45].mxu1 }
 0xcdb   : > { %v1688_v27 = vpop.f32.mrb[46].mxu1 }
 0xcdc   : > { %v2149_v28 = vpop.f32.mrb[47].mxu1  ;;  %v1692_v29 = vadd.f32 %v1691_v25, %v2430_v6  ;;  %v1916_v6 = vld [vmem:[%s2718_s7] ss:$0 sm:$0xff] }
 0xcde   : > { %v1693_v30 = vsel %vm385_vm1, %v1692_v29, 0.0 }
 0xcdf   : > { %1694 = vadd.xlane.f32.xlu0 %v1693_v30 }
 0xd6c   : > { %v1695_v31 = vpop.xlane.xlu0 %1694 }
 0xd6d   : > { %v1697_v32 = vmul.f32 0.03125, %v1695_v31 }
 0xd6f   : > { %v1698_v33 = vsub.f32 %v1692_v29, %v1697_v32 }
 0xd71   : > { %v1699_v34 = vmul.f32 %v1698_v33, %v1698_v33 }
 0xd73   : > { %v1700_v35 = vsel %vm385_vm1, %v1699_v34, 0.0 }
 0xd74   : > { %1701 = vadd.xlane.f32.xlu1 %v1700_v35 }
 0xe01   : > { %v1702_v36 = vpop.xlane.xlu1 %1701 }
 0xe02   : > { %v1703_v37 = vmul.f32 0.03125, %v1702_v36 }
 0xe04   : > { %v1704_v38 = vadd.f32 1e-05, %v1703_v37 }
 0xe06   : > { %2231 = vrsqrt.f32 %v1704_v38 }
 0xe10   : > { %v2232_v8 = vpop.eup %2231 }
 0xe11   : > { %v1706_v39 = vmul.f32 %v2232_v8, %v1698_v33 }
 0xe13   : > { %v1714_v41 = vmul.f32 %v1916_v6, %v1706_v39 }
 0xe15   : > { %v1722_v42 = vadd.f32 %v1917_v40, %v1714_v41 }
 0xe17   : > { %1723 = vst.msk [vmem:[%s349_s24] sm:$0xff] %vm385_vm1, %v1722_v42 }
 0xe18   : > { %2246 = shalt.err (!%p2243_p3)
}
 0xe19   : > { %s2247_s14 = scalar_lea.hbm %s2668_s28, 128  ;;  %s2251_s24 = scalar_lea.hbm %s2720_s9, 256 }
 0xe1a   : > { %p2248_p4 = scmp.ne.s32.totalorder %s2668_s28, %s2247_s14  ;;  %p2252_p9 = scmp.lt.u32.totalorder %s2668_s28, %s2720_s9 }
 0xe1b   : > { %p2253_p10 = scmp.lt.u32.totalorder %s2251_s24, %s2247_s14  ;;  %p2255_p12 = scmp.lt.u32.totalorder %s2247_s14, %s2668_s28 }
 0xe1c   : > { %p2249_p7 = pnand %p2248_p4, %p2388_p5 }
 0xe1d   : > { %p2254_p11 = por %p2253_p10, %p2252_p9 }
 0xe1e   : > { %p2250_p8 = pneg %p2249_p7 }
 0xe1f   : > { %p2256_p13 = por %p2255_p12, %p2254_p11 }
 0xe21   : > { %p2257_p0 = pnand %p2256_p13, %p2250_p8 }
 0xe23   : > { %2260 = shalt.err (!%p2257_p0)
}
 0xe24   : > { %2150 = dma.vmem_to_hbm [thread:$0]  (%p2388_p5), %s2670_s25, 128, %s2668_s28, %s1725_s17  }
 0xe25 PF: > { %p2156_p1 = scmp.ge.s32.totalorder %s2295_s12, 2  ;;  %s1750_s21 = sand.u32 1, %s2283_s30  }
 0xe26   : > { %s1751_s13 = scalar_lea.sflag [#allocation3], %s1750_s21 }
 0xe27   : > { %p2153_p2 = pnand %p2156_p1, %p2392_p6 }
 0xe29   : > { %2278 = dma.done.wait (!%p2153_p2), %s1751_s13, 128  }
 0xe2a   : > { %2280 = vsyncadd (!%p2153_p2), %s1751_s13, 4294967168  ;;  %p19_p3 = scmp.ge.s32.totalorder %s2375_s15, 4   ;;  %s2723_s30 = smov %s2287_s10 }
 0xe2b   : > { %s2724_s10 = smov %s2291_s11  ;;  %s2725_s11 = smov %s2386_s18 }
 0xe2c   : > { %s2726_s12 = smov %s2375_s15  ;;  %21 = sbr.rel (!%p19_p3) target bundleno = 3 (0x3), region = 109 }
 0xe33   :  { %1756 = vsyncpa [#allocation3], 1 }
 0xe34   :  { %1758 = vsyncpa [#allocation3 + $0x1], 1 }

</bundles_post_ra>
